<compile_context>
chip_gen: v6e
topology: v6e:2x2x1
jax: 0.10.0
libtpu: 0.0.40
codegen_flags: <defaults>
</compile_context>

<pallas_src>
import functools

import jax
import jax.numpy as jnp
from jax.experimental import pallas as pl
from jax.experimental.pallas import tpu as pltpu


# ----------------------------------------------------------------------------
# Hardware-aware configuration
# ----------------------------------------------------------------------------

_MIB = 1024 * 1024


def _hw_config():
    cap = None
    try:
        cap = getattr(pltpu.get_tpu_info(), "vmem_capacity_bytes", None)
    except Exception:
        cap = None
    if not cap:
        try:
            kind = jax.devices()[0].device_kind.lower()
            cap = 64 * _MIB if "v7" in kind else 128 * _MIB
        except Exception:
            cap = 64 * _MIB
    if cap >= 100 * _MIB:
        return 96 * _MIB, 512          # v5e / v6e: 128 MiB VMEM
    return 48 * _MIB, 256              # v7x: 64 MiB VMEM per TensorCore


_VMEM_LIMIT, _TM_MAX = _hw_config()
_TN_MAX = 512


def _round_up(x, m):
    return (x + m - 1) // m * m


def _tile(size, max_tile):
    """Pick (tile, padded_size): tile multiple of 128, minimal padding."""
    sp = _round_up(size, 128)
    ntiles = -(-sp // max_tile)
    t = _round_up(-(-sp // ntiles), 128)
    return t, t * ntiles


def _pair(v):
    return (v, v) if isinstance(v, int) else v


# ----------------------------------------------------------------------------
# Pallas kernels
# ----------------------------------------------------------------------------

def _matmul_bias_act_kernel(x_ref, w_ref, b_ref, o_ref, *, relu):
    """Fused (M,K)@(K,N) matmul + per-channel bias + ReLU (BN scale is in w)."""
    acc = jnp.dot(x_ref[...], w_ref[...], preferred_element_type=jnp.float32)
    acc = acc + b_ref[...]
    if relu:
        acc = jnp.maximum(acc, 0.0)
    o_ref[...] = acc.astype(o_ref.dtype)


def _conv_flat_kernel(x_ref, w_ref, b_ref, o_ref, *, kh, kw, wp, relu):
    """Stride-1 KxK conv on one image, flattened (H*W, C) layout.

    x_ref: (1, Mfull, Cin)   zero-padded image flattened row-major,
                             Mfull = (Hp [+1 if kw>1]) * Wp
    w_ref: (kh*kw, Cin, Cout) bf16 (BN scale folded in)
    b_ref: (1, Cout) f32
    o_ref: (1, Mout, Cout)   with Mout = OH * Wp; the caller slices the
                             (kw-1) garbage columns off each output row.
    Each tap is one large MXU dot accumulated into a single f32 accumulator.
    """
    mout = o_ref.shape[1]
    cout = o_ref.shape[2]
    acc = jnp.zeros((mout, cout), jnp.float32)
    for i in range(kh):
        for j in range(kw):
            off = i * wp + j
            acc = acc + jnp.dot(x_ref[0, pl.ds(off, mout), :],
                                w_ref[i * kw + j],
                                preferred_element_type=jnp.float32)
    acc = acc + b_ref[...]
    if relu:
        acc = jnp.maximum(acc, 0.0)
    o_ref[0] = acc.astype(o_ref.dtype)


def _avg_pool_kernel(x_ref, o_ref):
    """3x3 / stride 1 / pad 1 avg pool (count_include_pad), separable sums."""
    oh, ow = o_ref.shape[1], o_ref.shape[2]
    cs = (x_ref[0, :, 0:ow, :].astype(jnp.float32)
          + x_ref[0, :, 1:ow + 1, :].astype(jnp.float32)
          + x_ref[0, :, 2:ow + 2, :].astype(jnp.float32))
    out = cs[0:oh] + cs[1:oh + 1] + cs[2:oh + 2]
    o_ref[0] = (out * (1.0 / 9.0)).astype(o_ref.dtype)


def _max_pool_kernel(x_ref, o_ref):
    """3x3 window max at stride 1 (valid), separable; caller subsamples by 2."""
    oh, ow = o_ref.shape[1], o_ref.shape[2]
    cm = jnp.maximum(jnp.maximum(x_ref[0, :, 0:ow, :],
                                 x_ref[0, :, 1:ow + 1, :]),
                     x_ref[0, :, 2:ow + 2, :])
    o_ref[0] = jnp.maximum(jnp.maximum(cm[0:oh], cm[1:oh + 1]), cm[2:oh + 2])


def _head_kernel(x_ref, w_ref, b_ref, o_ref):
    """Global spatial mean + Linear(2048, 1) + Sigmoid.

    x_ref: (N, HW, C) bf16   w_ref: (1, C) f32   b_ref: (1, 1) f32
    o_ref: (N, 1) f32
    """
    xm = jnp.mean(x_ref[...].astype(jnp.float32), axis=1)          # (N, C)
    y = jnp.sum(xm * w_ref[...], axis=-1, keepdims=True) + b_ref[...]
    o_ref[...] = jax.nn.sigmoid(y)


# ----------------------------------------------------------------------------
# pallas_call wrappers (cached per shape)
# ----------------------------------------------------------------------------

@functools.lru_cache(maxsize=None)
def _get_matmul_fn(mp, k, np_, tm, tn, relu):
    kern = functools.partial(_matmul_bias_act_kernel, relu=relu)
    fn = pl.pallas_call(
        kern,
        out_shape=jax.ShapeDtypeStruct((mp, np_), jnp.bfloat16),
        grid=(mp // tm, np_ // tn),
        in_specs=[
            pl.BlockSpec((tm, k), lambda i, j: (i, 0)),
            pl.BlockSpec((k, tn), lambda i, j: (0, j)),
            pl.BlockSpec((1, tn), lambda i, j: (0, j)),
        ],
        out_specs=pl.BlockSpec((tm, tn), lambda i, j: (i, j)),
        compiler_params=pltpu.CompilerParams(
            dimension_semantics=("parallel", "parallel"),
            vmem_limit_bytes=_VMEM_LIMIT,
        ),
    )
    return jax.jit(fn)


@functools.lru_cache(maxsize=None)
def _get_conv_flat_fn(n, mfull, cin, cout, kh, kw, wp, mout, relu):
    kern = functools.partial(_conv_flat_kernel, kh=kh, kw=kw, wp=wp, relu=relu)
    fn = pl.pallas_call(
        kern,
        out_shape=jax.ShapeDtypeStruct((n, mout, cout), jnp.bfloat16),
        grid=(n,),
        in_specs=[
            pl.BlockSpec((1, mfull, cin), lambda b: (b, 0, 0)),
            pl.BlockSpec((kh * kw, cin, cout), lambda b: (0, 0, 0)),
            pl.BlockSpec((1, cout), lambda b: (0, 0)),
        ],
        out_specs=pl.BlockSpec((1, mout, cout), lambda b: (b, 0, 0)),
        compiler_params=pltpu.CompilerParams(
            dimension_semantics=("parallel",),
            vmem_limit_bytes=_VMEM_LIMIT,
        ),
    )
    return jax.jit(fn)


@functools.lru_cache(maxsize=None)
def _get_avg_pool_fn(n, hp, wp, c):
    oh, ow = hp - 2, wp - 2
    fn = pl.pallas_call(
        _avg_pool_kernel,
        out_shape=jax.ShapeDtypeStruct((n, oh, ow, c), jnp.bfloat16),
        grid=(n,),
        in_specs=[pl.BlockSpec((1, hp, wp, c), lambda b: (b, 0, 0, 0))],
        out_specs=pl.BlockSpec((1, oh, ow, c), lambda b: (b, 0, 0, 0)),
        compiler_params=pltpu.CompilerParams(
            dimension_semantics=("parallel",),
            vmem_limit_bytes=_VMEM_LIMIT,
        ),
    )
    return jax.jit(fn)


@functools.lru_cache(maxsize=None)
def _get_max_pool_fn(n, h, w_, c):
    oh, ow = h - 2, w_ - 2
    fn = pl.pallas_call(
        _max_pool_kernel,
        out_shape=jax.ShapeDtypeStruct((n, oh, ow, c), jnp.bfloat16),
        grid=(n,),
        in_specs=[pl.BlockSpec((1, h, w_, c), lambda b: (b, 0, 0, 0))],
        out_specs=pl.BlockSpec((1, oh, ow, c), lambda b: (b, 0, 0, 0)),
        compiler_params=pltpu.CompilerParams(
            dimension_semantics=("parallel",),
            vmem_limit_bytes=_VMEM_LIMIT,
        ),
    )
    return jax.jit(fn)


@functools.lru_cache(maxsize=None)
def _get_head_fn(n, hw, c):
    fn = pl.pallas_call(
        _head_kernel,
        out_shape=jax.ShapeDtypeStruct((n, 1), jnp.float32),
        compiler_params=pltpu.CompilerParams(vmem_limit_bytes=_VMEM_LIMIT),
    )
    return jax.jit(fn)


# ----------------------------------------------------------------------------
# Layer-level ops (NHWC, bf16 activations)
# ----------------------------------------------------------------------------

def _im2col_nhwc(x, kh, kw, sh, sw, ph, pw):
    """Transpose-free NHWC im2col (only used for the 5 stride-2 convs)."""
    n, h, w_, c = x.shape
    xp = jnp.pad(x, ((0, 0), (ph, ph), (pw, pw), (0, 0)))
    oh = (h + 2 * ph - kh) // sh + 1
    ow = (w_ + 2 * pw - kw) // sw + 1
    cols = []
    for i in range(kh):
        for j in range(kw):
            cols.append(xp[:, i:i + (oh - 1) * sh + 1:sh,
                           j:j + (ow - 1) * sw + 1:sw, :])
    return jnp.concatenate(cols, axis=-1), oh, ow


def matmul_bias_act(x2d, w2d, bias, relu=True):
    """(M, K) @ (K, N) + bias[N] (+ReLU); bf16 in, f32 MXU accumulation."""
    m, k = x2d.shape
    n_out = w2d.shape[1]
    tm, mp = _tile(m, _TM_MAX)
    tn, np_ = _tile(n_out, _TN_MAX)
    xp = x2d if mp == m else jnp.pad(x2d, ((0, mp - m), (0, 0)))
    wpad = w2d if np_ == n_out else jnp.pad(w2d, ((0, 0), (0, np_ - n_out)))
    bpad = bias if np_ == n_out else jnp.pad(bias, ((0, 0), (0, np_ - n_out)))
    out = _get_matmul_fn(mp, k, np_, tm, tn, bool(relu))(xp, wpad, bpad)
    if mp != m or np_ != n_out:
        out = out[:m, :n_out]
    return out


def conv_bn_act(x, p, relu=True):
    """BasicConv2d: conv (no bias) + folded eval-mode BN + ReLU. NHWC in/out."""
    kh, kw = p["ksize"]
    sh, sw = p["stride"]
    ph, pw = p["padding"]
    n, h, w_, cin = x.shape
    cout = p["w"].shape[-1]

    if (sh, sw) != (1, 1):
        patches, oh, ow = _im2col_nhwc(x, kh, kw, sh, sw, ph, pw)
        y = matmul_bias_act(patches.reshape(n * oh * ow, kh * kw * cin),
                            p["w"].reshape(kh * kw * cin, cout),
                            p["bias"], relu)
        return y.reshape(n, oh, ow, cout)

    if kh == 1 and kw == 1 and ph == 0 and pw == 0:
        y = matmul_bias_act(x.reshape(n * h * w_, cin),
                            p["w"].reshape(cin, cout),
                            p["bias"], relu)
        return y.reshape(n, h, w_, cout)

    # Stride-1 KxK conv: flattened-spatial per-image kernel; each tap is one
    # (OH*Wp, Cin)@(Cin, Cout) MXU dot into a single f32 accumulator.
    oh = h + 2 * ph - kh + 1
    ow = w_ + 2 * pw - kw + 1
    wp = w_ + 2 * pw
    extra = 1 if kw > 1 else 0             # one extra zero row so every tap
    hp2 = h + 2 * ph + extra               # slice stays in-bounds
    xp = jnp.pad(x, ((0, 0), (ph, ph + extra), (pw, pw), (0, 0)))
    xf = xp.reshape(n, hp2 * wp, cin)
    mout = oh * wp
    fn = _get_conv_flat_fn(n, hp2 * wp, cin, cout, kh, kw, wp, mout,
                           bool(relu))
    y = fn(xf, p["w"], p["bias"]).reshape(n, oh, wp, cout)
    if wp != ow:
        y = y[:, :, :ow, :]                # drop the (kw-1) garbage columns
    return y


def avg_pool_3x3(x):
    """AvgPool2d(3, stride=1, padding=1), count_include_pad=True. NHWC."""
    n, h, w_, c = x.shape
    xp = jnp.pad(x, ((0, 0), (1, 1), (1, 1), (0, 0)))
    return _get_avg_pool_fn(n, h + 2, w_ + 2, c)(xp)


def max_pool_3x3_s2(x):
    """MaxPool2d(3, stride=2). In-kernel 3x3 window max, stride-2 subsample."""
    n, h, w_, c = x.shape
    full = _get_max_pool_fn(n, h, w_, c)(x)       # (n, h-2, w-2, c)
    return full[:, ::2, ::2, :]


def head(x, fc_w, fc_b):
    """x: (N, HW, C) bf16 -> (N, 1) f32 (mean + Linear + Sigmoid fused)."""
    n, hw, c = x.shape
    return _get_head_fn(n, hw, c)(x, fc_w, fc_b)


def _split_channels(x, sizes):
    outs, off = [], 0
    for s in sizes:
        outs.append(x[..., off:off + s])
        off += s
    return outs


# ----------------------------------------------------------------------------
# Deterministic synthetic parameters (shapes match torchvision Inception3)
# ----------------------------------------------------------------------------

class _ParamGen:
    def __init__(self, key):
        self._key = key
        self._i = 0

    def next(self):
        self._i += 1
        return jax.random.fold_in(self._key, self._i)


def make_basic_conv(pg, cin, cout, k, stride=1, padding=0, input_affine=None):
    kh, kw = _pair(k)
    sh, sw = _pair(stride)
    ph, pw = _pair(padding)
    kc, kg, kb, km = jax.random.split(pg.next(), 4)
    fan_in = cin * kh * kw
    w = jax.random.normal(kc, (cout, cin, kh, kw), jnp.float32) * (2.0 / fan_in) ** 0.5
    # eval-mode BatchNorm2d(eps=1e-3) folded into a per-channel scale/bias
    gamma = 1.0 + 0.05 * jax.random.normal(kg, (cout,), jnp.float32)
    beta = 0.05 * jax.random.normal(kb, (cout,), jnp.float32)
    r_mean = 0.05 * jax.random.normal(km, (cout,), jnp.float32)
    r_var = jnp.ones((cout,), jnp.float32)
    scale = gamma / jnp.sqrt(r_var + 1e-3)
    bias = beta - r_mean * scale
    if input_affine is not None:
        # Fold transform_input's per-input-channel affine x -> a*x + t exactly:
        # conv(w, a*x + t) = conv(w*a, x) + sum_{c,i,j} w[o,c,i,j] * t_c
        a, t = input_affine
        extra = jnp.einsum("ocij,c->o", w, t)
        w = w * a.reshape(1, cin, 1, 1)
        bias = bias + scale * extra
    # Fold the BN scale into the conv weights (one fewer kernel operand).
    w = w * scale.reshape(cout, 1, 1, 1)
    # kernel-ready: weight (kh*kw, Cin, Cout) bf16, bias (1, Cout) f32
    w_prep = jnp.transpose(w, (2, 3, 1, 0)).reshape(kh * kw, cin, cout)
    return dict(w=w_prep.astype(jnp.bfloat16),
                bias=bias.reshape(1, cout),
                ksize=(kh, kw), stride=(sh, sw), padding=(ph, pw))


def _fuse_1x1(convs):
    """Fuse several same-input 1x1 stride-1 convs into one (concat Cout)."""
    return dict(
        w=jnp.concatenate([c["w"] for c in convs], axis=-1),
        bias=jnp.concatenate([c["bias"] for c in convs], axis=-1),
        ksize=(1, 1), stride=(1, 1), padding=(0, 0),
        split=tuple(int(c["w"].shape[-1]) for c in convs))


def make_inception_a(pg, cin, pool_features):
    p = dict(
        branch1x1=make_basic_conv(pg, cin, 64, 1),
        branch5x5_1=make_basic_conv(pg, cin, 48, 1),
        branch5x5_2=make_basic_conv(pg, 48, 64, 5, padding=2),
        branch3x3dbl_1=make_basic_conv(pg, cin, 64, 1),
        branch3x3dbl_2=make_basic_conv(pg, 64, 96, 3, padding=1),
        branch3x3dbl_3=make_basic_conv(pg, 96, 96, 3, padding=1),
        branch_pool=make_basic_conv(pg, cin, pool_features, 1),
    )
    p["fused_1x1"] = _fuse_1x1([p["branch1x1"], p["branch5x5_1"],
                                p["branch3x3dbl_1"]])
    return p


def inception_a(x, p):
    f = conv_bn_act(x, p["fused_1x1"])
    b1, b5, bd = _split_channels(f, p["fused_1x1"]["split"])
    b5 = conv_bn_act(b5, p["branch5x5_2"])
    bd = conv_bn_act(bd, p["branch3x3dbl_2"])
    bd = conv_bn_act(bd, p["branch3x3dbl_3"])
    bp = conv_bn_act(avg_pool_3x3(x), p["branch_pool"])
    return jnp.concatenate([b1, b5, bd, bp], axis=-1)


def make_inception_b(pg, cin):
    return dict(
        branch3x3=make_basic_conv(pg, cin, 384, 3, stride=2),
        branch3x3dbl_1=make_basic_conv(pg, cin, 64, 1),
        branch3x3dbl_2=make_basic_conv(pg, 64, 96, 3, padding=1),
        branch3x3dbl_3=make_basic_conv(pg, 96, 96, 3, stride=2),
    )


def inception_b(x, p):
    b3 = conv_bn_act(x, p["branch3x3"])
    bd = conv_bn_act(x, p["branch3x3dbl_1"])
    bd = conv_bn_act(bd, p["branch3x3dbl_2"])
    bd = conv_bn_act(bd, p["branch3x3dbl_3"])
    bp = max_pool_3x3_s2(x)
    return jnp.concatenate([b3, bd, bp], axis=-1)


def make_inception_c(pg, cin, c7):
    p = dict(
        branch1x1=make_basic_conv(pg, cin, 192, 1),
        branch7x7_1=make_basic_conv(pg, cin, c7, 1),
        branch7x7_2=make_basic_conv(pg, c7, c7, (1, 7), padding=(0, 3)),
        branch7x7_3=make_basic_conv(pg, c7, 192, (7, 1), padding=(3, 0)),
        branch7x7dbl_1=make_basic_conv(pg, cin, c7, 1),
        branch7x7dbl_2=make_basic_conv(pg, c7, c7, (7, 1), padding=(3, 0)),
        branch7x7dbl_3=make_basic_conv(pg, c7, c7, (1, 7), padding=(0, 3)),
        branch7x7dbl_4=make_basic_conv(pg, c7, c7, (7, 1), padding=(3, 0)),
        branch7x7dbl_5=make_basic_conv(pg, c7, 192, (1, 7), padding=(0, 3)),
        branch_pool=make_basic_conv(pg, cin, 192, 1),
    )
    p["fused_1x1"] = _fuse_1x1([p["branch1x1"], p["branch7x7_1"],
                                p["branch7x7dbl_1"]])
    return p


def inception_c(x, p):
    f = conv_bn_act(x, p["fused_1x1"])
    b1, b7, bd = _split_channels(f, p["fused_1x1"]["split"])
    b7 = conv_bn_act(b7, p["branch7x7_2"])
    b7 = conv_bn_act(b7, p["branch7x7_3"])
    for name in ("branch7x7dbl_2", "branch7x7dbl_3",
                 "branch7x7dbl_4", "branch7x7dbl_5"):
        bd = conv_bn_act(bd, p[name])
    bp = conv_bn_act(avg_pool_3x3(x), p["branch_pool"])
    return jnp.concatenate([b1, b7, bd, bp], axis=-1)


def make_inception_d(pg, cin):
    p = dict(
        branch3x3_1=make_basic_conv(pg, cin, 192, 1),
        branch3x3_2=make_basic_conv(pg, 192, 320, 3, stride=2),
        branch7x7x3_1=make_basic_conv(pg, cin, 192, 1),
        branch7x7x3_2=make_basic_conv(pg, 192, 192, (1, 7), padding=(0, 3)),
        branch7x7x3_3=make_basic_conv(pg, 192, 192, (7, 1), padding=(3, 0)),
        branch7x7x3_4=make_basic_conv(pg, 192, 192, 3, stride=2),
    )
    p["fused_1x1"] = _fuse_1x1([p["branch3x3_1"], p["branch7x7x3_1"]])
    return p


def inception_d(x, p):
    f = conv_bn_act(x, p["fused_1x1"])
    b3, b7 = _split_channels(f, p["fused_1x1"]["split"])
    b3 = conv_bn_act(b3, p["branch3x3_2"])
    b7 = conv_bn_act(b7, p["branch7x7x3_2"])
    b7 = conv_bn_act(b7, p["branch7x7x3_3"])
    b7 = conv_bn_act(b7, p["branch7x7x3_4"])
    bp = max_pool_3x3_s2(x)
    return jnp.concatenate([b3, b7, bp], axis=-1)


def make_inception_e(pg, cin):
    p = dict(
        branch1x1=make_basic_conv(pg, cin, 320, 1),
        branch3x3_1=make_basic_conv(pg, cin, 384, 1),
        branch3x3_2a=make_basic_conv(pg, 384, 384, (1, 3), padding=(0, 1)),
        branch3x3_2b=make_basic_conv(pg, 384, 384, (3, 1), padding=(1, 0)),
        branch3x3dbl_1=make_basic_conv(pg, cin, 448, 1),
        branch3x3dbl_2=make_basic_conv(pg, 448, 384, 3, padding=1),
        branch3x3dbl_3a=make_basic_conv(pg, 384, 384, (1, 3), padding=(0, 1)),
        branch3x3dbl_3b=make_basic_conv(pg, 384, 384, (3, 1), padding=(1, 0)),
        branch_pool=make_basic_conv(pg, cin, 192, 1),
    )
    p["fused_1x1"] = _fuse_1x1([p["branch1x1"], p["branch3x3_1"],
                                p["branch3x3dbl_1"]])
    return p


def inception_e(x, p):
    f = conv_bn_act(x, p["fused_1x1"])
    b1, b3, bd = _split_channels(f, p["fused_1x1"]["split"])
    b3 = jnp.concatenate([conv_bn_act(b3, p["branch3x3_2a"]),
                          conv_bn_act(b3, p["branch3x3_2b"])], axis=-1)
    bd = conv_bn_act(bd, p["branch3x3dbl_2"])
    bd = jnp.concatenate([conv_bn_act(bd, p["branch3x3dbl_3a"]),
                          conv_bn_act(bd, p["branch3x3dbl_3b"])], axis=-1)
    bp = conv_bn_act(avg_pool_3x3(x), p["branch_pool"])
    return jnp.concatenate([b1, b3, bd, bp], axis=-1)


def make_inception_params(key):
    pg = _ParamGen(key)
    # transform_input per-channel affine (x*a + t), folded exactly into Conv2d_1a
    t_scale = jnp.array([0.229 / 0.5, 0.224 / 0.5, 0.225 / 0.5], jnp.float32)
    t_shift = jnp.array([(0.485 - 0.5) / 0.5, (0.456 - 0.5) / 0.5,
                         (0.406 - 0.5) / 0.5], jnp.float32)
    p = dict(
        Conv2d_1a_3x3=make_basic_conv(pg, 3, 32, 3, stride=2,
                                      input_affine=(t_scale, t_shift)),
        Conv2d_2a_3x3=make_basic_conv(pg, 32, 32, 3),
        Conv2d_2b_3x3=make_basic_conv(pg, 32, 64, 3, padding=1),
        Conv2d_3b_1x1=make_basic_conv(pg, 64, 80, 1),
        Conv2d_4a_3x3=make_basic_conv(pg, 80, 192, 3),
        Mixed_5b=make_inception_a(pg, 192, 32),
        Mixed_5c=make_inception_a(pg, 256, 64),
        Mixed_5d=make_inception_a(pg, 288, 64),
        Mixed_6a=make_inception_b(pg, 288),
        Mixed_6b=make_inception_c(pg, 768, 128),
        Mixed_6c=make_inception_c(pg, 768, 160),
        Mixed_6d=make_inception_c(pg, 768, 160),
        Mixed_6e=make_inception_c(pg, 768, 192),
        Mixed_7a=make_inception_d(pg, 768),
        Mixed_7b=make_inception_e(pg, 1280),
        Mixed_7c=make_inception_e(pg, 2048),
    )
    kfc_w, kfc_b = jax.random.split(pg.next())
    p["fc_w"] = jax.random.normal(kfc_w, (1, 2048), jnp.float32) / jnp.sqrt(2048.0)
    p["fc_b"] = 0.01 * jax.random.normal(kfc_b, (1, 1), jnp.float32)
    return p


# ----------------------------------------------------------------------------
# Forward pass (matches InceptionV3BinaryClassifier.forward, eval semantics)
# ----------------------------------------------------------------------------

def forward(x, params):
    """x: (N, 3, H, W) float32 NCHW (like the PyTorch module) -> (N, 1) f32."""
    x = jnp.transpose(x, (0, 2, 3, 1)).astype(jnp.bfloat16)   # NHWC, bf16
    # transform_input is folded into Conv2d_1a's weights/bias (exact).
    x = conv_bn_act(x, params["Conv2d_1a_3x3"])
    x = conv_bn_act(x, params["Conv2d_2a_3x3"])
    x = conv_bn_act(x, params["Conv2d_2b_3x3"])
    x = max_pool_3x3_s2(x)                                     # maxpool1
    x = conv_bn_act(x, params["Conv2d_3b_1x1"])
    x = conv_bn_act(x, params["Conv2d_4a_3x3"])
    x = max_pool_3x3_s2(x)                                     # maxpool2
    x = inception_a(x, params["Mixed_5b"])
    x = inception_a(x, params["Mixed_5c"])
    x = inception_a(x, params["Mixed_5d"])
    x = inception_b(x, params["Mixed_6a"])
    x = inception_c(x, params["Mixed_6b"])
    x = inception_c(x, params["Mixed_6c"])
    x = inception_c(x, params["Mixed_6d"])
    x = inception_c(x, params["Mixed_6e"])
    x = inception_d(x, params["Mixed_7a"])
    x = inception_e(x, params["Mixed_7b"])
    x = inception_e(x, params["Mixed_7c"])
    # avgpool (AdaptiveAvgPool2d((1,1))) + dropout (eval identity) +
    # .mean((2,3)) + Linear(2048, 1) + Sigmoid, fused into one Pallas kernel.
    n, h, w_, c = x.shape
    return head(x.reshape(n, h * w_, c), params["fc_w"], params["fc_b"])


if __name__ == "__main__":
    key = jax.random.PRNGKey(0)
    kx, kp = jax.random.split(key)
    # 75x75 is the minimum spatial size the Inception v3 stem accepts
    # (the usual 299x299 is just a larger instance of the same graph).
    x = jax.random.normal(kx, (2, 3, 75, 75), jnp.float32)
    params = make_inception_params(kp)
    y = jax.block_until_ready(forward(x, params))
    assert y.shape == (2, 1) and y.dtype == jnp.float32
    assert bool(jnp.all(jnp.isfinite(y)))
    assert bool(jnp.all((y >= 0.0) & (y <= 1.0)))
    print("KERNEL_OK")
</pallas_src>

<mosaic_0001>
module attributes {stable_mosaic.version = 11 : i64} {
  func.func @_matmul_bias_act_kernel(%arg0: i32, %arg1: i32, %arg2: memref<512x27xbf16, #tpu.memory_space<vmem>>, %arg3: memref<27x128xbf16, #tpu.memory_space<vmem>>, %arg4: memref<1x128xf32, #tpu.memory_space<vmem>>, %arg5: memref<512x128xbf16, #tpu.memory_space<vmem>>) attributes {dimension_semantics = [#tpu.dimension_semantics<parallel>, #tpu.dimension_semantics<parallel>], iteration_bounds = array<i64: 6, 1>, scalar_prefetch = 0 : i64, scratch_operands = 0 : i64, tpu.core_type = #tpu.core_type<tc>, window_params = [{transform_indices = @transform_0, window_bounds = array<i64: 512, 27>}, {transform_indices = @transform_1, window_bounds = array<i64: 27, 128>}, {transform_indices = @transform_2, window_bounds = array<i64: 1, 128>}, {transform_indices = @transform_3, window_bounds = array<i64: 512, 128>}]} {
    %c0 = arith.constant 0 : index
    %c0_0 = arith.constant 0 : index
    %0 = vector.load %arg2[%c0, %c0_0] : memref<512x27xbf16, #tpu.memory_space<vmem>>, vector<512x27xbf16>
    %c0_1 = arith.constant 0 : index
    %c0_2 = arith.constant 0 : index
    %1 = vector.load %arg3[%c0_1, %c0_2] : memref<27x128xbf16, #tpu.memory_space<vmem>>, vector<27x128xbf16>
    %cst = arith.constant dense<0.000000e+00> : vector<512x128xf32>
    %2 = tpu.matmul %0, %1, %cst {dimension_numbers = #tpu.dot_dimension_numbers<[1], [0], [0], [1], [0, 0, 1, 1], [], []>} : vector<512x27xbf16>, vector<27x128xbf16>, vector<512x128xf32> -> vector<512x128xf32>
    %c0_3 = arith.constant 0 : index
    %c0_4 = arith.constant 0 : index
    %3 = vector.load %arg4[%c0_3, %c0_4] : memref<1x128xf32, #tpu.memory_space<vmem>>, vector<1x128xf32>
    %4 = vector.broadcast %3 : vector<1x128xf32> to vector<512x128xf32>
    %5 = arith.addf %2, %4 : vector<512x128xf32>
    %cst_5 = arith.constant 0.000000e+00 : f32
    %6 = vector.broadcast %cst_5 : f32 to vector<512x128xf32>
    %7 = arith.maximumf %5, %6 : vector<512x128xf32>
    %8 = arith.truncf %7 : vector<512x128xf32> to vector<512x128xbf16>
    %c0_6 = arith.constant 0 : index
    %c0_7 = arith.constant 0 : index
    %9 = vector.load %arg5[%c0_6, %c0_7] : memref<512x128xbf16, #tpu.memory_space<vmem>>, vector<512x128xbf16>
    tpu.vector_store %arg5[%c0_6, %c0_7], %8 {strides = array<i32>} : memref<512x128xbf16, #tpu.memory_space<vmem>>, vector<512x128xbf16>,
    return
  }
  func.func @transform_0(%arg0: i32, %arg1: i32) -> (i32, i32) {
    %c0_i32 = arith.constant 0 : i32
    %c0_i32_0 = arith.constant 0 : i32
    return %arg0, %c0_i32 : i32, i32
  }
  func.func @transform_1(%arg0: i32, %arg1: i32) -> (i32, i32) {
    %c0_i32 = arith.constant 0 : i32
    %c0_i32_0 = arith.constant 0 : i32
    return %c0_i32, %arg1 : i32, i32
  }
  func.func @transform_2(%arg0: i32, %arg1: i32) -> (i32, i32) {
    %c0_i32 = arith.constant 0 : i32
    %c0_i32_0 = arith.constant 0 : i32
    return %c0_i32, %arg1 : i32, i32
  }
  func.func @transform_3(%arg0: i32, %arg1: i32) -> (i32, i32) {
    %c0_i32 = arith.constant 0 : i32
    return %arg0, %arg1 : i32, i32
  }
}

</mosaic_0001>

<bundles_post_ra>
// kernel: tpu_custom_call.1
= control target key start
LH: loop header
LB: loop body
LE: loop exit
PB: predicated region body
PF: predicated region fallthrough
CT: control target
= control target key end

     0   :  { %8 = vsyncpa [#allocation3], 0  ;;  %s2350_s0 = inlined_call_operand.vmem [shape: bf16[3072,27], index: 0, kind: input, shape index: {}]   ;;  %s2351_s1 = inlined_call_operand.vmem [shape: bf16[27,128], index: 1, kind: input, shape index: {}]   ;;  %s2352_s2 = inlined_call_operand.vmem [shape: f32[1,128], index: 2, kind: input, shape index: {}]   ;;  %s2353_s3 = inlined_call_operand.hbm [shape: bf16[3072,128], index: 3, kind: output, shape index: {}]  }
   0x1   :  { %10 = vsyncpa [#allocation3 + $0x1], 0  ;;  %s2057_s12 = smov 0   ;;  %s2059_s13 = smov 0  }
   0x2   :  { %s2061_s14 = smov 0   ;;  %s2063_s15 = smov 0  }
   0x3   :  { %s2065_s16 = smov 0   ;;  %s2067_s17 = smov 0  }
   0x4 LB: > { %s1355_s18 = sadd.s32 4294967295, %s2031_s17   ;;  %s1356_s19 = sadd.s32 4294967294, %s2031_s17   ;;  %s2031_s17 = sphi %s2067_s17, %s16_s17   ;;  %s2027_s16 = sphi %s2065_s16, %s2360_s16   ;;  %s2023_s15 = sphi %s2063_s15, %s2359_s15   ;;  %s2019_s14 = sphi %s2061_s14, %s2358_s14   ;;  %s2015_s13 = sphi %s2059_s13, %s2357_s13   ;;  %s2011_s12 = sphi %s2057_s12, %s2356_s12  }
   0x5   : > { %s28_s20 = sadd.s32 1, %s2027_s16  ;;  %s115_s21 = sadd.s32 1, %s2019_s14 }
   0x6   : > { %p30_p0 = scmp.ge.s32.totalorder %s28_s20, 6  ;;  %p125_p1 = scmp.ne.s32.totalorder %s2019_s14, %s2015_s13 }
   0x7   : > { %p126_p2 = scmp.eq.s32.totalorder %s1355_s18, 5  ;;  %p131_p3 = scmp.ne.s32.totalorder %s2015_s13, %s2011_s12 }
   0x8   : > { %s2362_s20 = smov (%p30_p0, %s28_s20), 0  ;;  %p132_p5 = scmp.eq.s32.totalorder %s1356_s19, 5 }
   0x9   : > { %p2097_p4 = por %p126_p2, %p125_p1  ;;  %s110_s23 = ssub.s32 %s2027_s16, %s2362_s20 }
   0xa   : > { %p1361_p6 = scmp.ge.s32.totalorder %s2031_s17, 1  ;;  %p113_p7 = scmp.eq.s32.totalorder %s110_s23, 0 }
   0xb   : > { %p2104_p8 = por %p132_p5, %p131_p3  ;;  %p172_p9 = scmp.lt.s32.totalorder %s2031_s17, 7 }
   0xc   : > { %s2110_s25 = scalar_select %p113_p7, %s2019_s14, %s115_s21  }
   0xd   : > { %p173_p10 = pnand %p1361_p6, %p172_p9 }
   0xe   : > { %s1363_s28 = sshll.u32 (!%p173_p10), %s2023_s15, 6  ;;  %s200_s10 = sand.u32 (!%p173_p10), 1, %s2015_s13  }
   0xf   : > { %176 = sbr.rel (%p173_p10) target bundleno = 308 (0x134), region = 32  ;;  %p204_p11 = scmp.lt.s32.totalorder (!%p173_p10), %s1363_s28, 383 }
  0x10   : > { %s1362_s11 = sshll.u32 (!%p173_p10), %s200_s10, 8  ;;  %s1565_s19 = sshll.u32 (!%p173_p10), %s2023_s15, 12 }
  0x11   : > { %s2206_s18 = scalar_lea.vmem (!%p173_p10), [#allocation2], %s1362_s11  ;;  %s2295_s27 = scalar_lea.hbm (!%p173_p10), %s2353_s3, %s1565_s19 }
  0x12   : > { %s1256_s21 = sshll.u32 (!%p173_p10), %s2206_s18, 4  ;;  %s2305_s15 = scalar_lea.sflag (!%p173_p10), [#allocation3], %s200_s10  ;;  %s2297_s21 = int_to_ptr.vmem [resolvable:$true] %s1256_s21 }
  0x13   : > { %s2034_s29 = smov (!%p173_p10), [#allocation2]  }
  0x14   : > { %v1921_v0 = vld [vmem:[%s2351_s1 + $0x8] sm:$0x3f]   ;;  %vm561_vm0 = vcmask 1044480   ;;  %vm562_vm1 = vcmask 1045504   ;;  %v2033_v1 = vmov 65535   ;;  %v1922_v5 = vld [vmem:[%s2351_s1] sm:$0xff]  }
  0x15   : > { %v563_v2 = vsel %vm561_vm0, 4294967295, %v2033_v1  ;;  %s2364_s28 = smov (!%p204_p11, %s1363_s28), 383  ;;  %vm464_vm2 = vcmask 220160   ;;  %v2191_v38 = vld [vmem:[%s2352_s2] ss:$0 sm:$0xff]  ;;  %s1959_s30 = sshll.u32 %s2034_s29, 4  ;;  %s1960_s30 = int_to_ptr.vmem [resolvable:$false] %s1959_s30 }
  0x16   : > { %v564_v3 = vsel %vm562_vm1, %v563_v2, 0  ;;  %s1364_s4 = sshll.u32 %s2364_s28, 2  ;;  %s1955_s28 = scalar_lea.vmem %s2297_s21, 4096 }
  0x17   : > { %v566_v4 = vand.u32 %v1921_v0, %v564_v3  ;;  %s2122_s7 = scalar_lea.vmem %s2350_s0, %s1364_s4  ;;  %p1956_p12 = scmp.ne.s32.totalorder %s2297_s21, %s1955_s28 }
  0x18   : > { %v1923_v6 = vld [vmem:[%s2122_s7] sm:$0xff]   ;;  %v1925_v8 = vld [vmem:[%s2122_s7 + $0x8] sm:$0xff]   ;;  %v1927_v10 = vld [vmem:[%s2122_s7 + $0x10] sm:$0xff]   ;;  %s1961_s4 = scalar_lea.vmem %s1960_s30, 8192  ;;  %p1962_p1 = scmp.lt.s32.totalorder %s2297_s21, %s1960_s30 }
  0x19   : > { %1791 = vmatprep.subr.bf16.mxu0 %v566_v4  ;;  %1859 = vmatprep.subr.bf16.mxu1 %v566_v4  ;;  %v1924_v7 = vld [vmem:[%s2122_s7 + $0x80] sm:$0xff]   ;;  %v1926_v9 = vld [vmem:[%s2122_s7 + $0x88] sm:$0xff]   ;;  %v1928_v11 = vld [vmem:[%s2122_s7 + $0x90] sm:$0xff]   ;;  %p1957_p13 = pnand %p1956_p12, %p2097_p4  ;;  %p1963_p2 = scmp.lt.s32.totalorder %s1961_s4, %s1955_s28 }
  0x1a   : > { %1792 = vmatpush3.bf16.msra.mxu0 %v566_v4  ;;  %1861 = vmatpush3.bf16.msra.mxu1 %v566_v4  ;;  %v1929_v12 = vld [vmem:[%s2122_s7 + $0x18] sm:$0xff]   ;;  %v1931_v14 = vld [vmem:[%s2122_s7 + $0x20] sm:$0xff]   ;;  %v1933_v16 = vld [vmem:[%s2122_s7 + $0x28] sm:$0xff]  }
  0x1b   : > { %1793 = vmatprep.subr.bf16.mxu0 %v1922_v5  ;;  %1860 = vmatprep.subr.bf16.mxu1 %v1922_v5  ;;  %v1930_v13 = vld [vmem:[%s2122_s7 + $0x98] sm:$0xff]   ;;  %v1932_v15 = vld [vmem:[%s2122_s7 + $0xa0] sm:$0xff]   ;;  %v1934_v17 = vld [vmem:[%s2122_s7 + $0xa8] sm:$0xff]   ;;  %p1958_p0 = pneg %p1957_p13  ;;  %p1964_p3 = por %p1963_p2, %p1962_p1 }
  0x1c   : > { %1795 = vmatprep.mubr.msk.bf16.mxu0 %vm464_vm2, %v1923_v6  ;;  %1827 = vmatprep.mubr.msk.bf16.mxu1 %vm464_vm2, %v1924_v7  ;;  %v1935_v18 = vld [vmem:[%s2122_s7 + $0x30] sm:$0xff]   ;;  %v1937_v20 = vld [vmem:[%s2122_s7 + $0x38] sm:$0xff]   ;;  %v1939_v22 = vld [vmem:[%s2122_s7 + $0x40] sm:$0xff]  }
  0x1d   : > { %v1936_v19 = vld [vmem:[%s2122_s7 + $0xb0] sm:$0xff]   ;;  %v1938_v21 = vld [vmem:[%s2122_s7 + $0xb8] sm:$0xff]   ;;  %v1940_v23 = vld [vmem:[%s2122_s7 + $0xc0] sm:$0xff]   ;;  %p1965_p5 = pnand %p1964_p3, %p1958_p0 }
  0x1e   : > { %1794 = vmatpush3.bf16.msra.mxu0 %v1922_v5  ;;  %1862 = vmatpush3.bf16.msra.mxu1 %v1922_v5  ;;  %v1941_v24 = vld [vmem:[%s2122_s7 + $0x48] sm:$0xff]   ;;  %v1943_v26 = vld [vmem:[%s2122_s7 + $0x50] sm:$0xff]   ;;  %v1945_v28 = vld [vmem:[%s2122_s7 + $0x58] sm:$0xff]  }
  0x1f   : > { %v1942_v25 = vld [vmem:[%s2122_s7 + $0xc8] sm:$0xff]   ;;  %v1944_v27 = vld [vmem:[%s2122_s7 + $0xd0] sm:$0xff]   ;;  %v1946_v29 = vld [vmem:[%s2122_s7 + $0xd8] sm:$0xff]  }
  0x20   : > { %v1947_v30 = vld [vmem:[%s2122_s7 + $0x60] sm:$0xff]   ;;  %v1949_v32 = vld [vmem:[%s2122_s7 + $0x68] sm:$0xff]   ;;  %v1951_v34 = vld [vmem:[%s2122_s7 + $0x70] sm:$0xff]  }
  0x21   : > { %1796 = vmatmul.mubr.msk.bf16.vlgmr.msra.gmra.mxu0 %vm464_vm2, %v1925_v8  ;;  %1828 = vmatmul.mubr.msk.bf16.vlgmr.msra.gmra.mxu1 %vm464_vm2, %v1926_v9  ;;  %v1948_v31 = vld [vmem:[%s2122_s7 + $0xe0] sm:$0xff]   ;;  %v1950_v33 = vld [vmem:[%s2122_s7 + $0xe8] sm:$0xff]   ;;  %v1952_v35 = vld [vmem:[%s2122_s7 + $0xf0] sm:$0xff]  }
  0x22   : > { %1799 = vmatprep.mubr.msk.bf16.mxu0 %vm464_vm2, %v1927_v10  ;;  %1831 = vmatprep.mubr.msk.bf16.mxu1 %vm464_vm2, %v1928_v11  ;;  %v1953_v36 = vld [vmem:[%s2122_s7 + $0x78] sm:$0xff]  }
  0x23   : > { %v1954_v37 = vld [vmem:[%s2122_s7 + $0xf8] sm:$0xff]  }
  0x29   : > { %1800 = vmatmul.mubr.msk.bf16.gmra.mxu0 %vm464_vm2, %v1929_v12  ;;  %1832 = vmatmul.mubr.msk.bf16.gmra.mxu1 %vm464_vm2, %v1930_v13 }
  0x2a   : > { %1803 = vmatprep.mubr.msk.bf16.mxu0 %vm464_vm2, %v1931_v14  ;;  %1835 = vmatprep.mubr.msk.bf16.mxu1 %vm464_vm2, %v1932_v15 }
  0x31   : > { %1804 = vmatmul.mubr.msk.bf16.gmra.mxu0 %vm464_vm2, %v1933_v16  ;;  %1836 = vmatmul.mubr.msk.bf16.gmra.mxu1 %vm464_vm2, %v1934_v17 }
  0x32   : > { %1807 = vmatprep.mubr.msk.bf16.mxu0 %vm464_vm2, %v1935_v18  ;;  %1839 = vmatprep.mubr.msk.bf16.mxu1 %vm464_vm2, %v1936_v19 }
  0x39   : > { %1808 = vmatmul.mubr.msk.bf16.gmra.mxu0 %vm464_vm2, %v1937_v20  ;;  %1840 = vmatmul.mubr.msk.bf16.gmra.mxu1 %vm464_vm2, %v1938_v21 }
  0x3a   : > { %1811 = vmatprep.mubr.msk.bf16.mxu0 %vm464_vm2, %v1939_v22  ;;  %1843 = vmatprep.mubr.msk.bf16.mxu1 %vm464_vm2, %v1940_v23 }
  0x41   : > { %1812 = vmatmul.mubr.msk.bf16.gmra.mxu0 %vm464_vm2, %v1941_v24  ;;  %1844 = vmatmul.mubr.msk.bf16.gmra.mxu1 %vm464_vm2, %v1942_v25 }
  0x42   : > { %1815 = vmatprep.mubr.msk.bf16.mxu0 %vm464_vm2, %v1943_v26  ;;  %1847 = vmatprep.mubr.msk.bf16.mxu1 %vm464_vm2, %v1944_v27 }
  0x49   : > { %1816 = vmatmul.mubr.msk.bf16.gmra.mxu0 %vm464_vm2, %v1945_v28  ;;  %1848 = vmatmul.mubr.msk.bf16.gmra.mxu1 %vm464_vm2, %v1946_v29 }
  0x4a   : > { %1819 = vmatprep.mubr.msk.bf16.mxu0 %vm464_vm2, %v1947_v30  ;;  %1851 = vmatprep.mubr.msk.bf16.mxu1 %vm464_vm2, %v1948_v31 }
  0x51   : > { %1820 = vmatmul.mubr.msk.bf16.gmra.mxu0 %vm464_vm2, %v1949_v32  ;;  %1852 = vmatmul.mubr.msk.bf16.gmra.mxu1 %vm464_vm2, %v1950_v33 }
  0x52   : > { %1823 = vmatprep.mubr.msk.bf16.mxu0 %vm464_vm2, %v1951_v34  ;;  %1855 = vmatprep.mubr.msk.bf16.mxu1 %vm464_vm2, %v1952_v35 }
  0x59   : > { %1824 = vmatmul.mubr.msk.bf16.gmra.mxu0 %vm464_vm2, %v1953_v36  ;;  %1856 = vmatmul.mubr.msk.bf16.gmra.mxu1 %vm464_vm2, %v1954_v37 }
  0xe1   : > { %v1797_v39 = vpop.f32.mrf.mxu0  ;;  %v1829_v40 = vpop.f32.mrf.mxu1 }
  0xe2   : > { %v611_v41 = vadd.f32 %v1797_v39, %v2191_v38  ;;  %v739_v42 = vadd.f32 %v1829_v40, %v2191_v38 }
  0xe3   : > { %v602_v43 = vpop.f32.mrf.mxu0  ;;  %v730_v44 = vpop.f32.mrf.mxu1 }
  0xe4   : > { %v603_v45 = vadd.f32 %v2191_v38, %v602_v43  ;;  %v731_v46 = vadd.f32 %v2191_v38, %v730_v44  ;;  %v859_v51 = vmax.f32 %v611_v41, 0.0  ;;  %v891_v52 = vmax.f32 %v739_v42, 0.0 }
  0xe5   : > { %v1798_v47 = vpop.f32.mrf.mxu0  ;;  %v1830_v48 = vpop.f32.mrf.mxu1 }
  0xe6   : > { %v614_v49 = vadd.f32 %v1798_v47, %v2191_v38  ;;  %v742_v50 = vadd.f32 %v1830_v48, %v2191_v38  ;;  %v857_v59 = vmax.f32 %v603_v45, 0.0  ;;  %v889_v60 = vmax.f32 %v731_v46, 0.0 }
  0xe7   : > { %v605_v53 = vpop.f32.mrf.mxu0  ;;  %v733_v54 = vpop.f32.mrf.mxu1 }
  0xe8   : > { %v860_v55 = vmax.f32 %v614_v49, 0.0  ;;  %v892_v56 = vmax.f32 %v742_v50, 0.0  ;;  %v606_v57 = vadd.f32 %v2191_v38, %v605_v53  ;;  %v734_v58 = vadd.f32 %v2191_v38, %v733_v54 }
  0xe9   : > { %v1801_v61 = vpop.f32.mrf.mxu0  ;;  %v1833_v62 = vpop.f32.mrf.mxu1 }
  0xea   : > { %v1574_v63 = vpack.c.bf16 %v860_v55, %v859_v51  ;;  %v1654_v0 = vpack.c.bf16 %v892_v56, %v891_v52  ;;  %v858_v1 = vmax.f32 %v606_v57, 0.0  ;;  %v890_v2 = vmax.f32 %v734_v58, 0.0 }
  0xeb   : > { %v627_v3 = vadd.f32 %v1801_v61, %v2191_v38  ;;  %v755_v4 = vadd.f32 %v1833_v62, %v2191_v38  ;;  %v618_v5 = vpop.f32.mrf.mxu0  ;;  %v746_v6 = vpop.f32.mrf.mxu1 }
  0xec   : > { %1726 = vst [vmem:[%s2206_s18 + $0x8] sm:$0xff] %v1574_v63   ;;  %1742 = vst [vmem:[%s2206_s18 + $0x88] sm:$0xff] %v1654_v0   ;;  %v1569_v7 = vpack.c.bf16 %v858_v1, %v857_v59  ;;  %v1649_v8 = vpack.c.bf16 %v890_v2, %v889_v60  ;;  %v619_v9 = vadd.f32 %v2191_v38, %v618_v5 }
  0xed   : > { %v747_v10 = vadd.f32 %v2191_v38, %v746_v6  ;;  %v1802_v11 = vpop.f32.mrf.mxu0  ;;  %v1834_v12 = vpop.f32.mrf.mxu1  ;;  %v863_v15 = vmax.f32 %v627_v3, 0.0  ;;  %v895_v16 = vmax.f32 %v755_v4, 0.0 }
  0xee   : > { %1570 = vst [vmem:[%s2206_s18] sm:$0xff] %v1569_v7   ;;  %1741 = vst [vmem:[%s2206_s18 + $0x80] sm:$0xff] %v1649_v8   ;;  %v630_v13 = vadd.f32 %v1802_v11, %v2191_v38  ;;  %v758_v14 = vadd.f32 %v1834_v12, %v2191_v38  ;;  %v861_v23 = vmax.f32 %v619_v9, 0.0 }
  0xef   : > { %v621_v17 = vpop.f32.mrf.mxu0  ;;  %v749_v18 = vpop.f32.mrf.mxu1  ;;  %v893_v24 = vmax.f32 %v747_v10, 0.0 }
  0xf0   : > { %v864_v19 = vmax.f32 %v630_v13, 0.0  ;;  %v896_v20 = vmax.f32 %v758_v14, 0.0  ;;  %v622_v21 = vadd.f32 %v2191_v38, %v621_v17  ;;  %v750_v22 = vadd.f32 %v2191_v38, %v749_v18 }
  0xf1   : > { %v1805_v25 = vpop.f32.mrf.mxu0  ;;  %v1837_v26 = vpop.f32.mrf.mxu1 }
  0xf2   : > { %v1584_v27 = vpack.c.bf16 %v864_v19, %v863_v15  ;;  %v1664_v28 = vpack.c.bf16 %v896_v20, %v895_v16  ;;  %v862_v29 = vmax.f32 %v622_v21, 0.0  ;;  %v894_v30 = vmax.f32 %v750_v22, 0.0 }
  0xf3   : > { %v643_v31 = vadd.f32 %v1805_v25, %v2191_v38  ;;  %v771_v32 = vadd.f32 %v1837_v26, %v2191_v38  ;;  %v634_v33 = vpop.f32.mrf.mxu0  ;;  %v762_v34 = vpop.f32.mrf.mxu1 }
  0xf4   : > { %1728 = vst [vmem:[%s2206_s18 + $0x18] sm:$0xff] %v1584_v27   ;;  %1744 = vst [vmem:[%s2206_s18 + $0x98] sm:$0xff] %v1664_v28   ;;  %v1579_v35 = vpack.c.bf16 %v862_v29, %v861_v23  ;;  %v1659_v36 = vpack.c.bf16 %v894_v30, %v893_v24  ;;  %v635_v37 = vadd.f32 %v2191_v38, %v634_v33 }
  0xf5   : > { %v763_v39 = vadd.f32 %v2191_v38, %v762_v34  ;;  %v1806_v40 = vpop.f32.mrf.mxu0  ;;  %v1838_v41 = vpop.f32.mrf.mxu1  ;;  %v867_v44 = vmax.f32 %v643_v31, 0.0  ;;  %v899_v45 = vmax.f32 %v771_v32, 0.0 }
  0xf6   : > { %1727 = vst [vmem:[%s2206_s18 + $0x10] sm:$0xff] %v1579_v35   ;;  %1743 = vst [vmem:[%s2206_s18 + $0x90] sm:$0xff] %v1659_v36   ;;  %v646_v42 = vadd.f32 %v1806_v40, %v2191_v38  ;;  %v774_v43 = vadd.f32 %v1838_v41, %v2191_v38  ;;  %v865_v52 = vmax.f32 %v635_v37, 0.0 }
  0xf7   : > { %v637_v46 = vpop.f32.mrf.mxu0  ;;  %v765_v47 = vpop.f32.mrf.mxu1  ;;  %v897_v53 = vmax.f32 %v763_v39, 0.0 }
  0xf8   : > { %v868_v48 = vmax.f32 %v646_v42, 0.0  ;;  %v900_v49 = vmax.f32 %v774_v43, 0.0  ;;  %v638_v50 = vadd.f32 %v2191_v38, %v637_v46  ;;  %v766_v51 = vadd.f32 %v2191_v38, %v765_v47 }
  0xf9   : > { %v1809_v54 = vpop.f32.mrf.mxu0  ;;  %v1841_v55 = vpop.f32.mrf.mxu1 }
  0xfa   : > { %v1594_v56 = vpack.c.bf16 %v868_v48, %v867_v44  ;;  %v1674_v57 = vpack.c.bf16 %v900_v49, %v899_v45  ;;  %v866_v58 = vmax.f32 %v638_v50, 0.0  ;;  %v898_v59 = vmax.f32 %v766_v51, 0.0 }
  0xfb   : > { %v659_v60 = vadd.f32 %v1809_v54, %v2191_v38  ;;  %v787_v61 = vadd.f32 %v1841_v55, %v2191_v38  ;;  %v650_v62 = vpop.f32.mrf.mxu0  ;;  %v778_v63 = vpop.f32.mrf.mxu1 }
  0xfc   : > { %1730 = vst [vmem:[%s2206_s18 + $0x28] sm:$0xff] %v1594_v56   ;;  %1746 = vst [vmem:[%s2206_s18 + $0xa8] sm:$0xff] %v1674_v57   ;;  %v1589_v0 = vpack.c.bf16 %v866_v58, %v865_v52  ;;  %v1669_v1 = vpack.c.bf16 %v898_v59, %v897_v53  ;;  %v651_v2 = vadd.f32 %v2191_v38, %v650_v62 }
  0xfd   : > { %v779_v3 = vadd.f32 %v2191_v38, %v778_v63  ;;  %v1810_v4 = vpop.f32.mrf.mxu0  ;;  %v1842_v5 = vpop.f32.mrf.mxu1  ;;  %v871_v8 = vmax.f32 %v659_v60, 0.0  ;;  %v903_v9 = vmax.f32 %v787_v61, 0.0 }
  0xfe   : > { %1729 = vst [vmem:[%s2206_s18 + $0x20] sm:$0xff] %v1589_v0   ;;  %1745 = vst [vmem:[%s2206_s18 + $0xa0] sm:$0xff] %v1669_v1   ;;  %v662_v6 = vadd.f32 %v1810_v4, %v2191_v38  ;;  %v790_v7 = vadd.f32 %v1842_v5, %v2191_v38  ;;  %v869_v16 = vmax.f32 %v651_v2, 0.0 }
  0xff   : > { %v653_v10 = vpop.f32.mrf.mxu0  ;;  %v781_v11 = vpop.f32.mrf.mxu1  ;;  %v901_v17 = vmax.f32 %v779_v3, 0.0 }
 0x100   : > { %v872_v12 = vmax.f32 %v662_v6, 0.0  ;;  %v904_v13 = vmax.f32 %v790_v7, 0.0  ;;  %v654_v14 = vadd.f32 %v2191_v38, %v653_v10  ;;  %v782_v15 = vadd.f32 %v2191_v38, %v781_v11 }
 0x101   : > { %v1813_v18 = vpop.f32.mrf.mxu0  ;;  %v1845_v19 = vpop.f32.mrf.mxu1 }
 0x102   : > { %v1604_v20 = vpack.c.bf16 %v872_v12, %v871_v8  ;;  %v1684_v21 = vpack.c.bf16 %v904_v13, %v903_v9  ;;  %v870_v22 = vmax.f32 %v654_v14, 0.0  ;;  %v902_v23 = vmax.f32 %v782_v15, 0.0 }
 0x103   : > { %v675_v24 = vadd.f32 %v1813_v18, %v2191_v38  ;;  %v803_v25 = vadd.f32 %v1845_v19, %v2191_v38  ;;  %v666_v26 = vpop.f32.mrf.mxu0  ;;  %v794_v27 = vpop.f32.mrf.mxu1 }
 0x104   : > { %1732 = vst [vmem:[%s2206_s18 + $0x38] sm:$0xff] %v1604_v20   ;;  %1748 = vst [vmem:[%s2206_s18 + $0xb8] sm:$0xff] %v1684_v21   ;;  %v1599_v28 = vpack.c.bf16 %v870_v22, %v869_v16  ;;  %v1679_v29 = vpack.c.bf16 %v902_v23, %v901_v17  ;;  %v667_v30 = vadd.f32 %v2191_v38, %v666_v26 }
 0x105   : > { %v795_v31 = vadd.f32 %v2191_v38, %v794_v27  ;;  %v1814_v32 = vpop.f32.mrf.mxu0  ;;  %v1846_v33 = vpop.f32.mrf.mxu1  ;;  %v875_v36 = vmax.f32 %v675_v24, 0.0  ;;  %v907_v37 = vmax.f32 %v803_v25, 0.0 }
 0x106   : > { %1731 = vst [vmem:[%s2206_s18 + $0x30] sm:$0xff] %v1599_v28   ;;  %1747 = vst [vmem:[%s2206_s18 + $0xb0] sm:$0xff] %v1679_v29   ;;  %v678_v34 = vadd.f32 %v1814_v32, %v2191_v38  ;;  %v806_v35 = vadd.f32 %v1846_v33, %v2191_v38  ;;  %v873_v45 = vmax.f32 %v667_v30, 0.0 }
 0x107   : > { %v669_v39 = vpop.f32.mrf.mxu0  ;;  %v797_v40 = vpop.f32.mrf.mxu1  ;;  %v905_v46 = vmax.f32 %v795_v31, 0.0 }
 0x108   : > { %v876_v41 = vmax.f32 %v678_v34, 0.0  ;;  %v908_v42 = vmax.f32 %v806_v35, 0.0  ;;  %v670_v43 = vadd.f32 %v2191_v38, %v669_v39  ;;  %v798_v44 = vadd.f32 %v2191_v38, %v797_v40 }
 0x109   : > { %v1817_v47 = vpop.f32.mrf.mxu0  ;;  %v1849_v48 = vpop.f32.mrf.mxu1 }
 0x10a   : > { %v1614_v49 = vpack.c.bf16 %v876_v41, %v875_v36  ;;  %v1694_v50 = vpack.c.bf16 %v908_v42, %v907_v37  ;;  %v874_v51 = vmax.f32 %v670_v43, 0.0  ;;  %v906_v52 = vmax.f32 %v798_v44, 0.0 }
 0x10b   : > { %v691_v53 = vadd.f32 %v1817_v47, %v2191_v38  ;;  %v819_v54 = vadd.f32 %v1849_v48, %v2191_v38  ;;  %v682_v55 = vpop.f32.mrf.mxu0  ;;  %v810_v56 = vpop.f32.mrf.mxu1 }
 0x10c   : > { %1734 = vst [vmem:[%s2206_s18 + $0x48] sm:$0xff] %v1614_v49   ;;  %1750 = vst [vmem:[%s2206_s18 + $0xc8] sm:$0xff] %v1694_v50   ;;  %v1609_v57 = vpack.c.bf16 %v874_v51, %v873_v45  ;;  %v1689_v58 = vpack.c.bf16 %v906_v52, %v905_v46  ;;  %v683_v59 = vadd.f32 %v2191_v38, %v682_v55 }
 0x10d   : > { %v811_v60 = vadd.f32 %v2191_v38, %v810_v56  ;;  %v1818_v61 = vpop.f32.mrf.mxu0  ;;  %v1850_v62 = vpop.f32.mrf.mxu1  ;;  %v879_v1 = vmax.f32 %v691_v53, 0.0  ;;  %v911_v2 = vmax.f32 %v819_v54, 0.0 }
 0x10e   : > { %1733 = vst [vmem:[%s2206_s18 + $0x40] sm:$0xff] %v1609_v57   ;;  %1749 = vst [vmem:[%s2206_s18 + $0xc0] sm:$0xff] %v1689_v58   ;;  %v694_v63 = vadd.f32 %v1818_v61, %v2191_v38  ;;  %v822_v0 = vadd.f32 %v1850_v62, %v2191_v38  ;;  %v877_v9 = vmax.f32 %v683_v59, 0.0 }
 0x10f   : > { %v685_v3 = vpop.f32.mrf.mxu0  ;;  %v813_v4 = vpop.f32.mrf.mxu1  ;;  %v909_v10 = vmax.f32 %v811_v60, 0.0 }
 0x110   : > { %v880_v5 = vmax.f32 %v694_v63, 0.0  ;;  %v912_v6 = vmax.f32 %v822_v0, 0.0  ;;  %v686_v7 = vadd.f32 %v2191_v38, %v685_v3  ;;  %v814_v8 = vadd.f32 %v2191_v38, %v813_v4 }
 0x111   : > { %v1821_v11 = vpop.f32.mrf.mxu0  ;;  %v1853_v12 = vpop.f32.mrf.mxu1 }
 0x112   : > { %v1624_v13 = vpack.c.bf16 %v880_v5, %v879_v1  ;;  %v1704_v14 = vpack.c.bf16 %v912_v6, %v911_v2  ;;  %v878_v15 = vmax.f32 %v686_v7, 0.0  ;;  %v910_v16 = vmax.f32 %v814_v8, 0.0 }
 0x113   : > { %v707_v17 = vadd.f32 %v1821_v11, %v2191_v38  ;;  %v835_v18 = vadd.f32 %v1853_v12, %v2191_v38  ;;  %v698_v19 = vpop.f32.mrf.mxu0  ;;  %v826_v20 = vpop.f32.mrf.mxu1 }
 0x114   : > { %1736 = vst [vmem:[%s2206_s18 + $0x58] sm:$0xff] %v1624_v13   ;;  %1752 = vst [vmem:[%s2206_s18 + $0xd8] sm:$0xff] %v1704_v14   ;;  %v1619_v21 = vpack.c.bf16 %v878_v15, %v877_v9  ;;  %v1699_v22 = vpack.c.bf16 %v910_v16, %v909_v10  ;;  %v699_v23 = vadd.f32 %v2191_v38, %v698_v19 }
 0x115   : > { %v827_v24 = vadd.f32 %v2191_v38, %v826_v20  ;;  %v1822_v25 = vpop.f32.mrf.mxu0  ;;  %v1854_v26 = vpop.f32.mrf.mxu1  ;;  %v883_v29 = vmax.f32 %v707_v17, 0.0  ;;  %v915_v30 = vmax.f32 %v835_v18, 0.0 }
 0x116   : > { %1735 = vst [vmem:[%s2206_s18 + $0x50] sm:$0xff] %v1619_v21   ;;  %1751 = vst [vmem:[%s2206_s18 + $0xd0] sm:$0xff] %v1699_v22   ;;  %v710_v27 = vadd.f32 %v1822_v25, %v2191_v38  ;;  %v838_v28 = vadd.f32 %v1854_v26, %v2191_v38  ;;  %v881_v37 = vmax.f32 %v699_v23, 0.0 }
 0x117   : > { %v701_v31 = vpop.f32.mrf.mxu0  ;;  %v829_v32 = vpop.f32.mrf.mxu1  ;;  %v913_v39 = vmax.f32 %v827_v24, 0.0 }
 0x118   : > { %v884_v33 = vmax.f32 %v710_v27, 0.0  ;;  %v916_v34 = vmax.f32 %v838_v28, 0.0  ;;  %v702_v35 = vadd.f32 %v2191_v38, %v701_v31  ;;  %v830_v36 = vadd.f32 %v2191_v38, %v829_v32 }
 0x119   : > { %v1825_v40 = vpop.f32.mrf.mxu0  ;;  %v1857_v41 = vpop.f32.mrf.mxu1 }
 0x11a   : > { %v1634_v42 = vpack.c.bf16 %v884_v33, %v883_v29  ;;  %v1714_v43 = vpack.c.bf16 %v916_v34, %v915_v30  ;;  %v882_v44 = vmax.f32 %v702_v35, 0.0  ;;  %v914_v45 = vmax.f32 %v830_v36, 0.0 }
 0x11b   : > { %v723_v46 = vadd.f32 %v1825_v40, %v2191_v38  ;;  %v851_v47 = vadd.f32 %v1857_v41, %v2191_v38  ;;  %v714_v48 = vpop.f32.mrf.mxu0  ;;  %v842_v49 = vpop.f32.mrf.mxu1 }
 0x11c   : > { %1738 = vst [vmem:[%s2206_s18 + $0x68] sm:$0xff] %v1634_v42   ;;  %1754 = vst [vmem:[%s2206_s18 + $0xe8] sm:$0xff] %v1714_v43   ;;  %v1629_v50 = vpack.c.bf16 %v882_v44, %v881_v37  ;;  %v1709_v51 = vpack.c.bf16 %v914_v45, %v913_v39  ;;  %v715_v52 = vadd.f32 %v2191_v38, %v714_v48 }
 0x11d   : > { %v843_v53 = vadd.f32 %v2191_v38, %v842_v49  ;;  %v1826_v54 = vpop.f32.mrf.mxu0  ;;  %v1858_v55 = vpop.f32.mrf.mxu1  ;;  %v887_v58 = vmax.f32 %v723_v46, 0.0  ;;  %v919_v59 = vmax.f32 %v851_v47, 0.0 }
 0x11e   : > { %1737 = vst [vmem:[%s2206_s18 + $0x60] sm:$0xff] %v1629_v50   ;;  %1753 = vst [vmem:[%s2206_s18 + $0xe0] sm:$0xff] %v1709_v51   ;;  %v726_v56 = vadd.f32 %v1826_v54, %v2191_v38  ;;  %v854_v57 = vadd.f32 %v1858_v55, %v2191_v38  ;;  %v885_v2 = vmax.f32 %v715_v52, 0.0 }
 0x11f   : > { %v717_v60 = vpop.f32.mrf.mxu0  ;;  %v845_v61 = vpop.f32.mrf.mxu1  ;;  %v917_v3 = vmax.f32 %v843_v53, 0.0 }
 0x120   : > { %v888_v62 = vmax.f32 %v726_v56, 0.0  ;;  %v920_v63 = vmax.f32 %v854_v57, 0.0  ;;  %v718_v0 = vadd.f32 %v2191_v38, %v717_v60  ;;  %v846_v1 = vadd.f32 %v2191_v38, %v845_v61 }
 0x122   : > { %v1644_v4 = vpack.c.bf16 %v888_v62, %v887_v58  ;;  %v1724_v5 = vpack.c.bf16 %v920_v63, %v919_v59  ;;  %v886_v6 = vmax.f32 %v718_v0, 0.0  ;;  %v918_v7 = vmax.f32 %v846_v1, 0.0 }
 0x124   : > { %1740 = vst [vmem:[%s2206_s18 + $0x78] sm:$0xff] %v1644_v4   ;;  %1756 = vst [vmem:[%s2206_s18 + $0xf8] sm:$0xff] %v1724_v5   ;;  %v1639_v38 = vpack.c.bf16 %v886_v6, %v885_v2  ;;  %v1719_v8 = vpack.c.bf16 %v918_v7, %v917_v3 }
 0x126   : > { %1739 = vst [vmem:[%s2206_s18 + $0x70] sm:$0xff] %v1639_v38   ;;  %1755 = vst [vmem:[%s2206_s18 + $0xf0] sm:$0xff] %v1719_v8  }
 0x127   : > { %1968 = shalt.err (!%p1965_p5)
}
 0x128   : > { %s1969_s5 = scalar_lea.hbm %s2295_s27, 4096  ;;  %s1973_s8 = scalar_lea.hbm %s2353_s3, 24576 }
 0x129   : > { %p1970_p6 = scmp.ne.s32.totalorder %s2295_s27, %s1969_s5  ;;  %p1974_p10 = scmp.lt.s32.totalorder %s2295_s27, %s2353_s3 }
 0x12a   : > { %p1975_p11 = scmp.lt.s32.totalorder %s1973_s8, %s1969_s5 }
 0x12b   : > { %p1971_p7 = pnand %p1970_p6, %p2097_p4 }
 0x12c   : > { %p1976_p12 = por %p1975_p11, %p1974_p10 }
 0x12d   : > { %p1972_p9 = pneg %p1971_p7 }
 0x12f   : > { %p1977_p13 = pnand %p1976_p12, %p1972_p9 }
 0x131   : > { %1980 = shalt.err (!%p1977_p13)
}
 0x132   : > { %s2035_s11 = smov 64   ;;  %s2036_s18 = smov 4  }
 0x133   : > { %1863 = dma.vmem_to_hbm [thread:$0]  (%p2097_p4), %s2297_s21, 4096, %s2295_s27, %s2305_s15, %s2035_s11, %s2035_s11, %s2036_s18  }
 0x134 PF: > { %p1869_p0 = scmp.ge.s32.totalorder %s2031_s17, 2  ;;  %s1271_s19 = sand.u32 1, %s2011_s12  }
 0x135   : > { %s1272_s23 = scalar_lea.sflag [#allocation3], %s1271_s19 }
 0x136   : > { %p1866_p1 = pnand %p1869_p0, %p2104_p8 }
 0x138   : > { %p1867_p2 = pneg %p1866_p1 }
 0x13a   : > { %2006 = dma.done.wait (%p1867_p2), %s1272_s23, 4096  }
 0x13b   : > { %2008 = vsyncadd (%p1867_p2), %s1272_s23, 4294963200  ;;  %s16_s17 = sadd.s32 1, %s2031_s17   ;;  %s2356_s12 = smov %s2015_s13 }
 0x13c   : > { %p13_p3 = scmp.ge.s32.totalorder %s16_s17, 8   ;;  %s2357_s13 = smov %s2019_s14 }
 0x13d   : > { %s2358_s14 = smov %s2110_s25  ;;  %s2359_s15 = smov %s2027_s16 }
 0x13e   : > { %s2360_s16 = smov %s2362_s20  ;;  %15 = sbr.rel (!%p13_p3) target bundleno = 4 (0x4), region = 73 }
 0x143   :  { %1277 = vsyncpa [#allocation3], 1 }
 0x144   :  { %1279 = vsyncpa [#allocation3 + $0x1], 1 }

</bundles_post_ra>
